<compile_context>
chip_gen: v7x
topology: tpu7x:2x2x1
jax: 0.10.0
libtpu: 0.0.40
codegen_flags: <defaults>
</compile_context>

<pallas_src>
import functools

import numpy as np
import jax
import jax.numpy as jnp
from jax import lax
from jax.experimental import pallas as pl
from jax.experimental.pallas import tpu as pltpu

LANE = 128   # feature dim padded to one full lane width
TM = 128     # dst rows per grid step (one full MXU-height f32 tile)


def _round_up(n, m):
    return ((n + m - 1) // m) * m


def _sage_layer_kernel(nbr_ref, x_ref, invdeg_ref, w_ref, b_ref, o_ref,
                       agg_ref, *, tm, k, apply_relu):
    """One dst tile of SAGEConv2: o = [relu]( mean_nbr(x) @ W + b )."""
    i = pl.program_id(0)

    # --- sparse neighbor gather + k-way sum, 8 dst rows per loop step -------
    # Neighbor indices live in SMEM (scalar prefetch).  Per group: 8*k
    # independent dynamic row loads (pipelineable), k-1 full-width (8, d)
    # VPU adds, one aligned (8, d) store.  Compact fori_loop keeps code size
    # independent of tm.
    def gather_group(g, carry):
        base = (i * tm + g * 8) * k
        acc = None
        for j in range(k):                                  # k is small, static
            rows = [x_ref[pl.ds(nbr_ref[base + r * k + j], 1), :]
                    for r in range(8)]
            slot = jnp.concatenate(rows, axis=0)            # (8, d_pad)
            acc = slot if acc is None else acc + slot
        agg_ref[pl.ds(pl.multiple_of(g * 8, 8), 8), :] = acc
        return carry

    lax.fori_loop(0, tm // 8, gather_group, 0)

    # --- mean + lin_l (+ relu), all on full (tm, d_pad) tiles ----------------
    agg = agg_ref[...] * invdeg_ref[...]       # exact 1/deg, precomputed on host
    y = jnp.dot(agg, w_ref[...], preferred_element_type=jnp.float32)   # MXU
    y = y + b_ref[...]
    if apply_relu:
        y = jnp.maximum(y, 0.0)
    o_ref[...] = y.astype(o_ref.dtype)


def sage_layer(x_pad, nbr_flat, invdeg_col, w_pad, b_pad, *, apply_relu, tm=TM):
    """One SAGEConv2 layer over padded inputs.

    x_pad     : [n_src_pad, d_pad] f32   source features (zero pad rows)
    nbr_flat  : [n_dst_pad * k]    int32 flattened neighbor table (scalar prefetch)
    invdeg_col: [n_dst_pad, 1]     f32   exact 1/deg per dst (0 for padded rows)
    w_pad     : [d_pad, d_pad]     f32   lin_l weight (applied as x @ W)
    b_pad     : [1, d_pad]         f32   lin_l bias
    """
    n_src_pad, d_pad = x_pad.shape
    n_dst_pad = invdeg_col.shape[0]
    assert tm % 8 == 0 and n_dst_pad % tm == 0
    k = nbr_flat.shape[0] // n_dst_pad
    kernel = functools.partial(_sage_layer_kernel, tm=tm, k=k,
                               apply_relu=apply_relu)
    return pl.pallas_call(
        kernel,
        out_shape=jax.ShapeDtypeStruct((n_dst_pad, d_pad), jnp.float32),
        grid_spec=pltpu.PrefetchScalarGridSpec(
            num_scalar_prefetch=1,
            grid=(n_dst_pad // tm,),
            in_specs=[
                # whole (small, sampled-batch) x stays VMEM-resident per tile
                pl.BlockSpec((n_src_pad, d_pad), lambda i, nbr: (0, 0)),
                pl.BlockSpec((tm, 1), lambda i, nbr: (i, 0)),
                # constant index_maps -> W / bias not re-DMA'd per dst tile
                pl.BlockSpec((d_pad, d_pad), lambda i, nbr: (0, 0)),
                pl.BlockSpec((1, d_pad), lambda i, nbr: (0, 0)),
            ],
            out_specs=pl.BlockSpec((tm, d_pad), lambda i, nbr: (i, 0)),
            scratch_shapes=[pltpu.VMEM((tm, d_pad), jnp.float32)],
        ),
        compiler_params=pltpu.CompilerParams(
            # dst tiles are independent -> both TensorCores on v7x (grid >= 2)
            dimension_semantics=("parallel",),
            vmem_limit_bytes=32 * 1024 * 1024,
        ),
    )(nbr_flat, x_pad, invdeg_col, w_pad, b_pad)


def build_neighbor_table(src, dst, n_src, n_dst):
    """Vectorized padded [n_dst, max_deg] neighbor table + degrees (no edge loop)."""
    src = np.asarray(src, np.int64)
    dst = np.asarray(dst, np.int64)
    deg = np.bincount(dst, minlength=n_dst).astype(np.int64)
    max_deg = max(int(deg.max()) if deg.size else 0, 1)
    order = np.argsort(dst, kind="stable")
    dst_s, src_s = dst[order], src[order]
    starts = np.zeros(n_dst + 1, np.int64)
    starts[1:] = np.cumsum(deg)
    slot = np.arange(dst_s.size, dtype=np.int64) - starts[dst_s]
    nbr = np.full((n_dst, max_deg), n_src, np.int32)   # pad slots -> zero row
    nbr[dst_s, slot] = src_s
    return nbr, deg.astype(np.float32), max_deg


def fastsage_forward(x, adjs, weights, biases, *, d_pad=LANE, tm=TM):
    """FastSAGE.forward(x, adjs) using per-layer Pallas SAGE kernels (eval mode)."""
    num_layers = len(adjs)
    d = x.shape[1]

    # Pad lin_l params to the 128-lane width once.  Padded rows/cols are inert:
    # padded x columns are zero, so padded output columns stay zero.
    w_pads, b_pads = [], []
    for w, b in zip(weights, biases):
        w_p = jnp.zeros((d_pad, d_pad), jnp.float32).at[:d, :d].set(w)
        b_p = jnp.zeros((1, d_pad), jnp.float32).at[:, :d].set(b)
        w_pads.append(w_p)   # f32 kept end-to-end -> no activation quantization
        b_pads.append(b_p)

    x_cur = jnp.zeros((x.shape[0], d_pad), jnp.float32).at[:, :d].set(x)

    n_dst = x.shape[0]
    for i, (edge_index, size) in enumerate(adjs):
        n_src, n_dst = size
        src, dst = edge_index

        # Source features for this hop: slice, plus >=1 guaranteed all-zero pad
        # row (target of padded neighbor slots), rows rounded up to a sublane.
        n_src_pad = _round_up(n_src + 1, 8)
        xs_pad = jnp.zeros((n_src_pad, d_pad), jnp.float32).at[:n_src].set(
            x_cur[:n_src])

        nbr, deg, k = build_neighbor_table(src, dst, n_src, n_dst)
        n_dst_pad = _round_up(n_dst, tm)
        nbr_pad = np.full((n_dst_pad, k), n_src, np.int32)
        nbr_pad[:n_dst] = nbr
        invdeg = np.zeros((n_dst_pad, 1), np.float32)
        invdeg[:n_dst, 0] = 1.0 / np.maximum(deg, 1.0)   # exact mean divisor

        x_cur = sage_layer(xs_pad,
                           jnp.asarray(nbr_pad.reshape(-1)),
                           jnp.asarray(invdeg),
                           w_pads[i], b_pads[i],
                           apply_relu=(i != num_layers - 1), tm=tm)
        # x_cur is [n_dst_pad, d_pad]; the x[:size[1]] slice is realized by the
        # next layer's source slice / the final return below.

    return x_cur[:n_dst, :d]


def fastsage_reference(x, adjs, weights, biases):
    """Pure-JAX f32 reference: scatter-mean aggregation + lin_l (+relu)."""
    num_layers = len(adjs)
    for i, (edge_index, size) in enumerate(adjs):
        n_src, n_dst = size
        src, dst = edge_index
        src = jnp.asarray(src)
        dst = jnp.asarray(dst)
        xs = x[:n_src]
        agg = jnp.zeros((n_dst, xs.shape[1]), xs.dtype).at[dst].add(xs[src])
        deg = jnp.zeros((n_dst,), xs.dtype).at[dst].add(1.0)
        mean = agg / jnp.maximum(deg, 1.0)[:, None]
        y = jnp.dot(mean, weights[i],
                    precision=jax.lax.Precision.HIGHEST) + biases[i]
        x = jnp.maximum(y, 0.0) if i != num_layers - 1 else y
    return x


if __name__ == "__main__":
    key = jax.random.PRNGKey(0)
    latent_dim = 32            # config['recdim']
    num_layers = 2             # config['layer']
    num_neighbors = 4          # config['num_neighbors']
    # sampled nodes per hop: keeps >= 2 (and even) dst tiles per layer at TM=128
    hop_sizes = [1024, 512, 256]

    k_x, k_w = jax.random.split(key, 2)

    # Initial node embeddings (output of get_initial_emb), [N0, latent_dim].
    x = jax.random.normal(k_x, (hop_sizes[0], latent_dim), jnp.float32)

    # Synthetic NeighborSampler adjs: ((src, dst), (n_src, n_dst)) per layer,
    # with variable per-dst fanout in [1, num_neighbors].
    rng = np.random.default_rng(0)
    adjs = []
    for i in range(num_layers):
        n_src, n_dst = hop_sizes[i], hop_sizes[i + 1]
        deg = rng.integers(1, num_neighbors + 1, size=n_dst)
        dst = np.repeat(np.arange(n_dst), deg)
        src = rng.integers(0, n_src, size=dst.size)
        adjs.append(((src.astype(np.int32), dst.astype(np.int32)),
                     (n_src, n_dst)))

    # SAGEConv2 lin_l parameters per init_parameters: xavier_uniform weight
    # (gain=0.1 for all but the last layer, gain=1.0 for the last), zero bias.
    weights, biases = [], []
    keys_w = jax.random.split(k_w, num_layers)
    for i in range(num_layers):
        gain = 1.0 if i == num_layers - 1 else 0.1
        bound = gain * (6.0 / (latent_dim + latent_dim)) ** 0.5
        w = jax.random.uniform(keys_w[i], (latent_dim, latent_dim),
                               jnp.float32, -bound, bound)
        weights.append(w)
        biases.append(jnp.zeros((1, latent_dim), jnp.float32))

    out = fastsage_forward(x, adjs, weights, biases)
    jax.block_until_ready(out)
    assert out.shape == (hop_sizes[-1], latent_dim)

    ref = fastsage_reference(x, adjs, weights, biases)
    err = float(jnp.max(jnp.abs(out - ref)))
    assert err < 1e-2, f"kernel/reference mismatch: max abs err = {err}"
    print("KERNEL_OK")
</pallas_src>

<mosaic_0001>
module attributes {stable_mosaic.version = 11 : i64} {
  func.func @_sage_layer_kernel(%arg0: i32, %arg1: memref<2048xi32, #tpu.memory_space<smem>>, %arg2: memref<1032x128xf32, #tpu.memory_space<vmem>>, %arg3: memref<128x1xf32, #tpu.memory_space<vmem>>, %arg4: memref<128x128xf32, #tpu.memory_space<vmem>>, %arg5: memref<1x128xf32, #tpu.memory_space<vmem>>, %arg6: memref<128x128xf32, #tpu.memory_space<vmem>>, %arg7: memref<128x128xf32, #tpu.memory_space<vmem>>) attributes {dimension_semantics = [#tpu.dimension_semantics<parallel>], iteration_bounds = array<i64: 4>, scalar_prefetch = 1 : i64, scratch_operands = 1 : i64, tpu.core_type = #tpu.core_type<tc>, window_params = [{pipeline_mode = #tpu.pipeline_mode<synchronous>, transform_indices = @transform_0, window_bounds = array<i64: 1032, 128>}, {transform_indices = @transform_1, window_bounds = array<i64: 128, 1>}, {pipeline_mode = #tpu.pipeline_mode<synchronous>, transform_indices = @transform_2, window_bounds = array<i64: 128, 128>}, {pipeline_mode = #tpu.pipeline_mode<synchronous>, transform_indices = @transform_3, window_bounds = array<i64: 1, 128>}, {transform_indices = @transform_4, window_bounds = array<i64: 128, 128>}]} {
    %c0_i32 = arith.constant 0 : i32
    %c16_i32 = arith.constant 16 : i32
    %0 = arith.addi %c0_i32, %c16_i32 : i32
    %c1_i32 = arith.constant 1 : i32
    scf.for %arg8 = %c0_i32 to %0 step %c1_i32  : i32 {
      %c128_i32 = arith.constant 128 : i32
      %13 = arith.muli %arg0, %c128_i32 : i32
      %c8_i32 = arith.constant 8 : i32
      %14 = arith.muli %arg8, %c8_i32 : i32
      %15 = arith.addi %13, %14 : i32
      %c4_i32 = arith.constant 4 : i32
      %16 = arith.muli %15, %c4_i32 : i32
      %c0_i32_11 = arith.constant 0 : i32
      %17 = arith.addi %16, %c0_i32_11 : i32
      %c0_i32_12 = arith.constant 0 : i32
      %18 = arith.addi %17, %c0_i32_12 : i32
      %19 = arith.index_cast %18 : i32 to index
      %20 = memref.load %arg1[%19] : memref<2048xi32, #tpu.memory_space<smem>>
      %21 = arith.index_cast %20 : i32 to index
      %c0_13 = arith.constant 0 : index
      %22 = vector.load %arg2[%21, %c0_13] : memref<1032x128xf32, #tpu.memory_space<vmem>>, vector<1x128xf32>
      %c4_i32_14 = arith.constant 4 : i32
      %23 = arith.addi %16, %c4_i32_14 : i32
      %c0_i32_15 = arith.constant 0 : i32
      %24 = arith.addi %23, %c0_i32_15 : i32
      %25 = arith.index_cast %24 : i32 to index
      %26 = memref.load %arg1[%25] : memref<2048xi32, #tpu.memory_space<smem>>
      %27 = arith.index_cast %26 : i32 to index
      %c0_16 = arith.constant 0 : index
      %28 = vector.load %arg2[%27, %c0_16] : memref<1032x128xf32, #tpu.memory_space<vmem>>, vector<1x128xf32>
      %c8_i32_17 = arith.constant 8 : i32
      %29 = arith.addi %16, %c8_i32_17 : i32
      %c0_i32_18 = arith.constant 0 : i32
      %30 = arith.addi %29, %c0_i32_18 : i32
      %31 = arith.index_cast %30 : i32 to index
      %32 = memref.load %arg1[%31] : memref<2048xi32, #tpu.memory_space<smem>>
      %33 = arith.index_cast %32 : i32 to index
      %c0_19 = arith.constant 0 : index
      %34 = vector.load %arg2[%33, %c0_19] : memref<1032x128xf32, #tpu.memory_space<vmem>>, vector<1x128xf32>
      %c12_i32 = arith.constant 12 : i32
      %35 = arith.addi %16, %c12_i32 : i32
      %c0_i32_20 = arith.constant 0 : i32
      %36 = arith.addi %35, %c0_i32_20 : i32
      %37 = arith.index_cast %36 : i32 to index
      %38 = memref.load %arg1[%37] : memref<2048xi32, #tpu.memory_space<smem>>
      %39 = arith.index_cast %38 : i32 to index
      %c0_21 = arith.constant 0 : index
      %40 = vector.load %arg2[%39, %c0_21] : memref<1032x128xf32, #tpu.memory_space<vmem>>, vector<1x128xf32>
      %c16_i32_22 = arith.constant 16 : i32
      %41 = arith.addi %16, %c16_i32_22 : i32
      %c0_i32_23 = arith.constant 0 : i32
      %42 = arith.addi %41, %c0_i32_23 : i32
      %43 = arith.index_cast %42 : i32 to index
      %44 = memref.load %arg1[%43] : memref<2048xi32, #tpu.memory_space<smem>>
      %45 = arith.index_cast %44 : i32 to index
      %c0_24 = arith.constant 0 : index
      %46 = vector.load %arg2[%45, %c0_24] : memref<1032x128xf32, #tpu.memory_space<vmem>>, vector<1x128xf32>
      %c20_i32 = arith.constant 20 : i32
      %47 = arith.addi %16, %c20_i32 : i32
      %c0_i32_25 = arith.constant 0 : i32
      %48 = arith.addi %47, %c0_i32_25 : i32
      %49 = arith.index_cast %48 : i32 to index
      %50 = memref.load %arg1[%49] : memref<2048xi32, #tpu.memory_space<smem>>
      %51 = arith.index_cast %50 : i32 to index
      %c0_26 = arith.constant 0 : index
      %52 = vector.load %arg2[%51, %c0_26] : memref<1032x128xf32, #tpu.memory_space<vmem>>, vector<1x128xf32>
      %c24_i32 = arith.constant 24 : i32
      %53 = arith.addi %16, %c24_i32 : i32
      %c0_i32_27 = arith.constant 0 : i32
      %54 = arith.addi %53, %c0_i32_27 : i32
      %55 = arith.index_cast %54 : i32 to index
      %56 = memref.load %arg1[%55] : memref<2048xi32, #tpu.memory_space<smem>>
      %57 = arith.index_cast %56 : i32 to index
      %c0_28 = arith.constant 0 : index
      %58 = vector.load %arg2[%57, %c0_28] : memref<1032x128xf32, #tpu.memory_space<vmem>>, vector<1x128xf32>
      %c28_i32 = arith.constant 28 : i32
      %59 = arith.addi %16, %c28_i32 : i32
      %c0_i32_29 = arith.constant 0 : i32
      %60 = arith.addi %59, %c0_i32_29 : i32
      %61 = arith.index_cast %60 : i32 to index
      %62 = memref.load %arg1[%61] : memref<2048xi32, #tpu.memory_space<smem>>
      %63 = arith.index_cast %62 : i32 to index
      %c0_30 = arith.constant 0 : index
      %64 = vector.load %arg2[%63, %c0_30] : memref<1032x128xf32, #tpu.memory_space<vmem>>, vector<1x128xf32>
      %65 = tpu.concatenate %22, %28, %34, %40, %46, %52, %58, %64 in 0 : vector<1x128xf32>, vector<1x128xf32>, vector<1x128xf32>, vector<1x128xf32>, vector<1x128xf32>, vector<1x128xf32>, vector<1x128xf32>, vector<1x128xf32> -> vector<8x128xf32>
      %c0_i32_31 = arith.constant 0 : i32
      %66 = arith.addi %16, %c0_i32_31 : i32
      %c1_i32_32 = arith.constant 1 : i32
      %67 = arith.addi %66, %c1_i32_32 : i32
      %68 = arith.index_cast %67 : i32 to index
      %69 = memref.load %arg1[%68] : memref<2048xi32, #tpu.memory_space<smem>>
      %70 = arith.index_cast %69 : i32 to index
      %c0_33 = arith.constant 0 : index
      %71 = vector.load %arg2[%70, %c0_33] : memref<1032x128xf32, #tpu.memory_space<vmem>>, vector<1x128xf32>
      %c4_i32_34 = arith.constant 4 : i32
      %72 = arith.addi %16, %c4_i32_34 : i32
      %c1_i32_35 = arith.constant 1 : i32
      %73 = arith.addi %72, %c1_i32_35 : i32
      %74 = arith.index_cast %73 : i32 to index
      %75 = memref.load %arg1[%74] : memref<2048xi32, #tpu.memory_space<smem>>
      %76 = arith.index_cast %75 : i32 to index
      %c0_36 = arith.constant 0 : index
      %77 = vector.load %arg2[%76, %c0_36] : memref<1032x128xf32, #tpu.memory_space<vmem>>, vector<1x128xf32>
      %c8_i32_37 = arith.constant 8 : i32
      %78 = arith.addi %16, %c8_i32_37 : i32
      %c1_i32_38 = arith.constant 1 : i32
      %79 = arith.addi %78, %c1_i32_38 : i32
      %80 = arith.index_cast %79 : i32 to index
      %81 = memref.load %arg1[%80] : memref<2048xi32, #tpu.memory_space<smem>>
      %82 = arith.index_cast %81 : i32 to index
      %c0_39 = arith.constant 0 : index
      %83 = vector.load %arg2[%82, %c0_39] : memref<1032x128xf32, #tpu.memory_space<vmem>>, vector<1x128xf32>
      %c12_i32_40 = arith.constant 12 : i32
      %84 = arith.addi %16, %c12_i32_40 : i32
      %c1_i32_41 = arith.constant 1 : i32
      %85 = arith.addi %84, %c1_i32_41 : i32
      %86 = arith.index_cast %85 : i32 to index
      %87 = memref.load %arg1[%86] : memref<2048xi32, #tpu.memory_space<smem>>
      %88 = arith.index_cast %87 : i32 to index
      %c0_42 = arith.constant 0 : index
      %89 = vector.load %arg2[%88, %c0_42] : memref<1032x128xf32, #tpu.memory_space<vmem>>, vector<1x128xf32>
      %c16_i32_43 = arith.constant 16 : i32
      %90 = arith.addi %16, %c16_i32_43 : i32
      %c1_i32_44 = arith.constant 1 : i32
      %91 = arith.addi %90, %c1_i32_44 : i32
      %92 = arith.index_cast %91 : i32 to index
      %93 = memref.load %arg1[%92] : memref<2048xi32, #tpu.memory_space<smem>>
      %94 = arith.index_cast %93 : i32 to index
      %c0_45 = arith.constant 0 : index
      %95 = vector.load %arg2[%94, %c0_45] : memref<1032x128xf32, #tpu.memory_space<vmem>>, vector<1x128xf32>
      %c20_i32_46 = arith.constant 20 : i32
      %96 = arith.addi %16, %c20_i32_46 : i32
      %c1_i32_47 = arith.constant 1 : i32
      %97 = arith.addi %96, %c1_i32_47 : i32
      %98 = arith.index_cast %97 : i32 to index
      %99 = memref.load %arg1[%98] : memref<2048xi32, #tpu.memory_space<smem>>
      %100 = arith.index_cast %99 : i32 to index
      %c0_48 = arith.constant 0 : index
      %101 = vector.load %arg2[%100, %c0_48] : memref<1032x128xf32, #tpu.memory_space<vmem>>, vector<1x128xf32>
      %c24_i32_49 = arith.constant 24 : i32
      %102 = arith.addi %16, %c24_i32_49 : i32
      %c1_i32_50 = arith.constant 1 : i32
      %103 = arith.addi %102, %c1_i32_50 : i32
      %104 = arith.index_cast %103 : i32 to index
      %105 = memref.load %arg1[%104] : memref<2048xi32, #tpu.memory_space<smem>>
      %106 = arith.index_cast %105 : i32 to index
      %c0_51 = arith.constant 0 : index
      %107 = vector.load %arg2[%106, %c0_51] : memref<1032x128xf32, #tpu.memory_space<vmem>>, vector<1x128xf32>
      %c28_i32_52 = arith.constant 28 : i32
      %108 = arith.addi %16, %c28_i32_52 : i32
      %c1_i32_53 = arith.constant 1 : i32
      %109 = arith.addi %108, %c1_i32_53 : i32
      %110 = arith.index_cast %109 : i32 to index
      %111 = memref.load %arg1[%110] : memref<2048xi32, #tpu.memory_space<smem>>
      %112 = arith.index_cast %111 : i32 to index
      %c0_54 = arith.constant 0 : index
      %113 = vector.load %arg2[%112, %c0_54] : memref<1032x128xf32, #tpu.memory_space<vmem>>, vector<1x128xf32>
      %114 = tpu.concatenate %71, %77, %83, %89, %95, %101, %107, %113 in 0 : vector<1x128xf32>, vector<1x128xf32>, vector<1x128xf32>, vector<1x128xf32>, vector<1x128xf32>, vector<1x128xf32>, vector<1x128xf32>, vector<1x128xf32> -> vector<8x128xf32>
      %115 = arith.addf %65, %114 : vector<8x128xf32>
      %c0_i32_55 = arith.constant 0 : i32
      %116 = arith.addi %16, %c0_i32_55 : i32
      %c2_i32 = arith.constant 2 : i32
      %117 = arith.addi %116, %c2_i32 : i32
      %118 = arith.index_cast %117 : i32 to index
      %119 = memref.load %arg1[%118] : memref<2048xi32, #tpu.memory_space<smem>>
      %120 = arith.index_cast %119 : i32 to index
      %c0_56 = arith.constant 0 : index
      %121 = vector.load %arg2[%120, %c0_56] : memref<1032x128xf32, #tpu.memory_space<vmem>>, vector<1x128xf32>
      %c4_i32_57 = arith.constant 4 : i32
      %122 = arith.addi %16, %c4_i32_57 : i32
      %c2_i32_58 = arith.constant 2 : i32
      %123 = arith.addi %122, %c2_i32_58 : i32
      %124 = arith.index_cast %123 : i32 to index
      %125 = memref.load %arg1[%124] : memref<2048xi32, #tpu.memory_space<smem>>
      %126 = arith.index_cast %125 : i32 to index
      %c0_59 = arith.constant 0 : index
      %127 = vector.load %arg2[%126, %c0_59] : memref<1032x128xf32, #tpu.memory_space<vmem>>, vector<1x128xf32>
      %c8_i32_60 = arith.constant 8 : i32
      %128 = arith.addi %16, %c8_i32_60 : i32
      %c2_i32_61 = arith.constant 2 : i32
      %129 = arith.addi %128, %c2_i32_61 : i32
      %130 = arith.index_cast %129 : i32 to index
      %131 = memref.load %arg1[%130] : memref<2048xi32, #tpu.memory_space<smem>>
      %132 = arith.index_cast %131 : i32 to index
      %c0_62 = arith.constant 0 : index
      %133 = vector.load %arg2[%132, %c0_62] : memref<1032x128xf32, #tpu.memory_space<vmem>>, vector<1x128xf32>
      %c12_i32_63 = arith.constant 12 : i32
      %134 = arith.addi %16, %c12_i32_63 : i32
      %c2_i32_64 = arith.constant 2 : i32
      %135 = arith.addi %134, %c2_i32_64 : i32
      %136 = arith.index_cast %135 : i32 to index
      %137 = memref.load %arg1[%136] : memref<2048xi32, #tpu.memory_space<smem>>
      %138 = arith.index_cast %137 : i32 to index
      %c0_65 = arith.constant 0 : index
      %139 = vector.load %arg2[%138, %c0_65] : memref<1032x128xf32, #tpu.memory_space<vmem>>, vector<1x128xf32>
      %c16_i32_66 = arith.constant 16 : i32
      %140 = arith.addi %16, %c16_i32_66 : i32
      %c2_i32_67 = arith.constant 2 : i32
      %141 = arith.addi %140, %c2_i32_67 : i32
      %142 = arith.index_cast %141 : i32 to index
      %143 = memref.load %arg1[%142] : memref<2048xi32, #tpu.memory_space<smem>>
      %144 = arith.index_cast %143 : i32 to index
      %c0_68 = arith.constant 0 : index
      %145 = vector.load %arg2[%144, %c0_68] : memref<1032x128xf32, #tpu.memory_space<vmem>>, vector<1x128xf32>
      %c20_i32_69 = arith.constant 20 : i32
      %146 = arith.addi %16, %c20_i32_69 : i32
      %c2_i32_70 = arith.constant 2 : i32
      %147 = arith.addi %146, %c2_i32_70 : i32
      %148 = arith.index_cast %147 : i32 to index
      %149 = memref.load %arg1[%148] : memref<2048xi32, #tpu.memory_space<smem>>
      %150 = arith.index_cast %149 : i32 to index
      %c0_71 = arith.constant 0 : index
      %151 = vector.load %arg2[%150, %c0_71] : memref<1032x128xf32, #tpu.memory_space<vmem>>, vector<1x128xf32>
      %c24_i32_72 = arith.constant 24 : i32
      %152 = arith.addi %16, %c24_i32_72 : i32
      %c2_i32_73 = arith.constant 2 : i32
      %153 = arith.addi %152, %c2_i32_73 : i32
      %154 = arith.index_cast %153 : i32 to index
      %155 = memref.load %arg1[%154] : memref<2048xi32, #tpu.memory_space<smem>>
      %156 = arith.index_cast %155 : i32 to index
      %c0_74 = arith.constant 0 : index
      %157 = vector.load %arg2[%156, %c0_74] : memref<1032x128xf32, #tpu.memory_space<vmem>>, vector<1x128xf32>
      %c28_i32_75 = arith.constant 28 : i32
      %158 = arith.addi %16, %c28_i32_75 : i32
      %c2_i32_76 = arith.constant 2 : i32
      %159 = arith.addi %158, %c2_i32_76 : i32
      %160 = arith.index_cast %159 : i32 to index
      %161 = memref.load %arg1[%160] : memref<2048xi32, #tpu.memory_space<smem>>
      %162 = arith.index_cast %161 : i32 to index
      %c0_77 = arith.constant 0 : index
      %163 = vector.load %arg2[%162, %c0_77] : memref<1032x128xf32, #tpu.memory_space<vmem>>, vector<1x128xf32>
      %164 = tpu.concatenate %121, %127, %133, %139, %145, %151, %157, %163 in 0 : vector<1x128xf32>, vector<1x128xf32>, vector<1x128xf32>, vector<1x128xf32>, vector<1x128xf32>, vector<1x128xf32>, vector<1x128xf32>, vector<1x128xf32> -> vector<8x128xf32>
      %165 = arith.addf %115, %164 : vector<8x128xf32>
      %c0_i32_78 = arith.constant 0 : i32
      %166 = arith.addi %16, %c0_i32_78 : i32
      %c3_i32 = arith.constant 3 : i32
      %167 = arith.addi %166, %c3_i32 : i32
      %168 = arith.index_cast %167 : i32 to index
      %169 = memref.load %arg1[%168] : memref<2048xi32, #tpu.memory_space<smem>>
      %170 = arith.index_cast %169 : i32 to index
      %c0_79 = arith.constant 0 : index
      %171 = vector.load %arg2[%170, %c0_79] : memref<1032x128xf32, #tpu.memory_space<vmem>>, vector<1x128xf32>
      %c4_i32_80 = arith.constant 4 : i32
      %172 = arith.addi %16, %c4_i32_80 : i32
      %c3_i32_81 = arith.constant 3 : i32
      %173 = arith.addi %172, %c3_i32_81 : i32
      %174 = arith.index_cast %173 : i32 to index
      %175 = memref.load %arg1[%174] : memref<2048xi32, #tpu.memory_space<smem>>
      %176 = arith.index_cast %175 : i32 to index
      %c0_82 = arith.constant 0 : index
      %177 = vector.load %arg2[%176, %c0_82] : memref<1032x128xf32, #tpu.memory_space<vmem>>, vector<1x128xf32>
      %c8_i32_83 = arith.constant 8 : i32
      %178 = arith.addi %16, %c8_i32_83 : i32
      %c3_i32_84 = arith.constant 3 : i32
      %179 = arith.addi %178, %c3_i32_84 : i32
      %180 = arith.index_cast %179 : i32 to index
      %181 = memref.load %arg1[%180] : memref<2048xi32, #tpu.memory_space<smem>>
      %182 = arith.index_cast %181 : i32 to index
      %c0_85 = arith.constant 0 : index
      %183 = vector.load %arg2[%182, %c0_85] : memref<1032x128xf32, #tpu.memory_space<vmem>>, vector<1x128xf32>
      %c12_i32_86 = arith.constant 12 : i32
      %184 = arith.addi %16, %c12_i32_86 : i32
      %c3_i32_87 = arith.constant 3 : i32
      %185 = arith.addi %184, %c3_i32_87 : i32
      %186 = arith.index_cast %185 : i32 to index
      %187 = memref.load %arg1[%186] : memref<2048xi32, #tpu.memory_space<smem>>
      %188 = arith.index_cast %187 : i32 to index
      %c0_88 = arith.constant 0 : index
      %189 = vector.load %arg2[%188, %c0_88] : memref<1032x128xf32, #tpu.memory_space<vmem>>, vector<1x128xf32>
      %c16_i32_89 = arith.constant 16 : i32
      %190 = arith.addi %16, %c16_i32_89 : i32
      %c3_i32_90 = arith.constant 3 : i32
      %191 = arith.addi %190, %c3_i32_90 : i32
      %192 = arith.index_cast %191 : i32 to index
      %193 = memref.load %arg1[%192] : memref<2048xi32, #tpu.memory_space<smem>>
      %194 = arith.index_cast %193 : i32 to index
      %c0_91 = arith.constant 0 : index
      %195 = vector.load %arg2[%194, %c0_91] : memref<1032x128xf32, #tpu.memory_space<vmem>>, vector<1x128xf32>
      %c20_i32_92 = arith.constant 20 : i32
      %196 = arith.addi %16, %c20_i32_92 : i32
      %c3_i32_93 = arith.constant 3 : i32
      %197 = arith.addi %196, %c3_i32_93 : i32
      %198 = arith.index_cast %197 : i32 to index
      %199 = memref.load %arg1[%198] : memref<2048xi32, #tpu.memory_space<smem>>
      %200 = arith.index_cast %199 : i32 to index
      %c0_94 = arith.constant 0 : index
      %201 = vector.load %arg2[%200, %c0_94] : memref<1032x128xf32, #tpu.memory_space<vmem>>, vector<1x128xf32>
      %c24_i32_95 = arith.constant 24 : i32
      %202 = arith.addi %16, %c24_i32_95 : i32
      %c3_i32_96 = arith.constant 3 : i32
      %203 = arith.addi %202, %c3_i32_96 : i32
      %204 = arith.index_cast %203 : i32 to index
      %205 = memref.load %arg1[%204] : memref<2048xi32, #tpu.memory_space<smem>>
      %206 = arith.index_cast %205 : i32 to index
      %c0_97 = arith.constant 0 : index
      %207 = vector.load %arg2[%206, %c0_97] : memref<1032x128xf32, #tpu.memory_space<vmem>>, vector<1x128xf32>
      %c28_i32_98 = arith.constant 28 : i32
      %208 = arith.addi %16, %c28_i32_98 : i32
      %c3_i32_99 = arith.constant 3 : i32
      %209 = arith.addi %208, %c3_i32_99 : i32
      %210 = arith.index_cast %209 : i32 to index
      %211 = memref.load %arg1[%210] : memref<2048xi32, #tpu.memory_space<smem>>
      %212 = arith.index_cast %211 : i32 to index
      %c0_100 = arith.constant 0 : index
      %213 = vector.load %arg2[%212, %c0_100] : memref<1032x128xf32, #tpu.memory_space<vmem>>, vector<1x128xf32>
      %214 = tpu.concatenate %171, %177, %183, %189, %195, %201, %207, %213 in 0 : vector<1x128xf32>, vector<1x128xf32>, vector<1x128xf32>, vector<1x128xf32>, vector<1x128xf32>, vector<1x128xf32>, vector<1x128xf32>, vector<1x128xf32> -> vector<8x128xf32>
      %215 = arith.addf %165, %214 : vector<8x128xf32>
      %c8_i32_101 = arith.constant 8 : i32
      %216 = arith.muli %arg8, %c8_i32_101 : i32
      %217 = tpu.assume_multiple %216, 8 : i32
      %218 = arith.index_cast %217 : i32 to index
      %c0_102 = arith.constant 0 : index
      %219 = vector.load %arg7[%218, %c0_102] : memref<128x128xf32, #tpu.memory_space<vmem>>, vector<8x128xf32>
      tpu.vector_store %arg7[%218, %c0_102], %215 {strides = array<i32>} : memref<128x128xf32, #tpu.memory_space<vmem>>, vector<8x128xf32>,
    }
    %c16_i32_0 = arith.constant 16 : i32
    %c0 = arith.constant 0 : index
    %c0_1 = arith.constant 0 : index
    %1 = vector.load %arg7[%c0, %c0_1] : memref<128x128xf32, #tpu.memory_space<vmem>>, vector<128x128xf32>
    %c0_2 = arith.constant 0 : index
    %c0_3 = arith.constant 0 : index
    %2 = vector.load %arg3[%c0_2, %c0_3] : memref<128x1xf32, #tpu.memory_space<vmem>>, vector<128x1xf32>
    %3 = vector.broadcast %2 : vector<128x1xf32> to vector<128x128xf32>
    %4 = arith.mulf %1, %3 : vector<128x128xf32>
    %c0_4 = arith.constant 0 : index
    %c0_5 = arith.constant 0 : index
    %5 = vector.load %arg4[%c0_4, %c0_5] : memref<128x128xf32, #tpu.memory_space<vmem>>, vector<128x128xf32>
    %cst = arith.constant dense<0.000000e+00> : vector<128x128xf32>
    %6 = tpu.matmul %4, %5, %cst {dimension_numbers = #tpu.dot_dimension_numbers<[1], [0], [0], [1], [0, 0, 1, 1], [], []>} : vector<128x128xf32>, vector<128x128xf32>, vector<128x128xf32> -> vector<128x128xf32>
    %c0_6 = arith.constant 0 : index
    %c0_7 = arith.constant 0 : index
    %7 = vector.load %arg5[%c0_6, %c0_7] : memref<1x128xf32, #tpu.memory_space<vmem>>, vector<1x128xf32>
    %8 = vector.broadcast %7 : vector<1x128xf32> to vector<128x128xf32>
    %9 = arith.addf %6, %8 : vector<128x128xf32>
    %cst_8 = arith.constant 0.000000e+00 : f32
    %10 = vector.broadcast %cst_8 : f32 to vector<128x128xf32>
    %11 = arith.maximumf %9, %10 : vector<128x128xf32>
    %c0_9 = arith.constant 0 : index
    %c0_10 = arith.constant 0 : index
    %12 = vector.load %arg6[%c0_9, %c0_10] : memref<128x128xf32, #tpu.memory_space<vmem>>, vector<128x128xf32>
    tpu.vector_store %arg6[%c0_9, %c0_10], %11 {strides = array<i32>} : memref<128x128xf32, #tpu.memory_space<vmem>>, vector<128x128xf32>,
    return
  }
  func.func @transform_0(%arg0: i32, %arg1: memref<2048xi32, #tpu.memory_space<smem>>) -> (i32, i32) {
    %c0_i32 = arith.constant 0 : i32
    %c0_i32_0 = arith.constant 0 : i32
    %c0_i32_1 = arith.constant 0 : i32
    return %c0_i32, %c0_i32_0 : i32, i32
  }
  func.func @transform_1(%arg0: i32, %arg1: memref<2048xi32, #tpu.memory_space<smem>>) -> (i32, i32) {
    %c0_i32 = arith.constant 0 : i32
    %c0_i32_0 = arith.constant 0 : i32
    return %arg0, %c0_i32 : i32, i32
  }
  func.func @transform_2(%arg0: i32, %arg1: memref<2048xi32, #tpu.memory_space<smem>>) -> (i32, i32) {
    %c0_i32 = arith.constant 0 : i32
    %c0_i32_0 = arith.constant 0 : i32
    %c0_i32_1 = arith.constant 0 : i32
    return %c0_i32, %c0_i32_0 : i32, i32
  }
  func.func @transform_3(%arg0: i32, %arg1: memref<2048xi32, #tpu.memory_space<smem>>) -> (i32, i32) {
    %c0_i32 = arith.constant 0 : i32
    %c0_i32_0 = arith.constant 0 : i32
    %c0_i32_1 = arith.constant 0 : i32
    return %c0_i32, %c0_i32_0 : i32, i32
  }
  func.func @transform_4(%arg0: i32, %arg1: memref<2048xi32, #tpu.memory_space<smem>>) -> (i32, i32) {
    %c0_i32 = arith.constant 0 : i32
    %c0_i32_0 = arith.constant 0 : i32
    return %arg0, %c0_i32 : i32, i32
  }
}

</mosaic_0001>

<bundles_post_ra>
// kernel: tpu_custom_call.1
= control target key start
LH: loop header
LB: loop body
LE: loop exit
PB: predicated region body
PF: predicated region fallthrough
CT: control target
= control target key end

     0   :  { %s1706_s0 = inlined_call_operand.vmem [shape: s32[2048], index: 0, kind: input, shape index: {}]   ;;  %s1707_s1 = inlined_call_operand.hbm [shape: f32[1032,128], index: 1, kind: input, shape index: {}]   ;;  %s1708_s2 = inlined_call_operand.vmem [shape: f32[512,1], index: 2, kind: input, shape index: {}]   ;;  %s1709_s3 = inlined_call_operand.vmem [shape: f32[128,128], index: 3, kind: input, shape index: {}]   ;;  %s1710_s4 = inlined_call_operand.vmem [shape: f32[1,128], index: 4, kind: input, shape index: {}]   ;;  %s1711_s5 = inlined_call_operand.hbm [shape: f32[512,128], index: 5, kind: output, shape index: {}]  }
   0x1   :  { %1726 = sst [smem:[#allocation19_spill]] %s1707_s1  ;;  %s10_s20 = sshll.u32 %s1706_s0, 4  ;;  %s11_s20 = int_to_ptr.vmem [resolvable:$true] %s10_s20 }
   0x2   :  { %1727 = sst [smem:[#allocation20_spill]] %s1708_s2  ;;  %s1158_s21 = scalar_lea.vmem %s11_s20, 256 }
   0x3   :  { %1728 = sst [smem:[#allocation21_spill]] %s1711_s5  ;;  %p1159_p0 = scmp.ne.s32.totalorder %s11_s20, %s1158_s21 }
   0x4   :  { %p1163_p1 = scmp.lt.s32.totalorder %s11_s20, %s11_s20  ;;  %p1164_p2 = scmp.lt.s32.totalorder %s1158_s21, %s1158_s21 }
   0x6   :  { %p1165_p3 = por %p1164_p2, %p1163_p1 }
   0x8   :  { %p1166_p4 = pnand %p1165_p3, %p1159_p0 }
   0xa   :  { %1169 = shalt.err (!%p1166_p4)  }
   0xb   :  { %s1276_s22 = smov [#allocation4]  }
   0xc   :  { %13 = dma.vmem_to_smem %s11_s20, 256, %s1276_s22, [#allocation3] }
   0xd   :  { %1246 = dma.done.wait [#allocation3], 256 }
   0xe   :  { %1247 = vsyncadd [#allocation3], 4294967040 }
   0xf   :  { %15 = sfence }
  0x10   :  { %16 = vsyncpa [#allocation6], 0 }
  0x11   :  { %17 = vsyncpa [#allocation7], 0 }
  0x12   :  { %19 = vsyncpa [#allocation7 + $0x1], 0  ;;  %s1317_s23 = smov 0   ;;  %s1319_s24 = smov 0  }
  0x13   :  { %s1321_s0 = smov 0   ;;  %s1323_s25 = smov 0  }
  0x14 LB: > { %1729 = sst [smem:[#allocation12_spill]] %s1258_s23  ;;  %s1338_s26 = sadd.s32 4294967295, %s1270_s25   ;;  %s1270_s25 = sphi %s1323_s25, %s1755_s25   ;;  %s1266_s0 = sphi %s1321_s0, %s1760_s0   ;;  %s1262_s24 = sphi %s1319_s24, %s1759_s24   ;;  %s1258_s23 = sphi %s1317_s23, %s1758_s23  }
  0x15   : > { %1730 = sst [smem:[#allocation13_spill]] %s1266_s0  ;;  %s937_s27 = sadd.s32 4294967294, %s1270_s25  }
  0x16   : > { %1731 = sst [smem:[#allocation14_spill]] %s1270_s25  ;;  %s1342_s28 = sadd.s32 1, %s1270_s25  }
  0x17   : > { %1732 = sst [smem:[#allocation15_spill]] %s1342_s28  ;;  %s121_s29 = sadd.s32 1, %s1266_s0 }
  0x18   : > { %s118_s30 = ssub.s32 %s1270_s25, %s1342_s28  ;;  %p131_p5 = scmp.ne.s32.totalorder %s1266_s0, %s1262_s24 }
  0x19   : > { %p119_p6 = scmp.eq.s32.totalorder %s118_s30, 0  ;;  %p132_p7 = scmp.eq.s32.totalorder %s1338_s26, 3 }
  0x1a   : > { %p137_p8 = scmp.ne.s32.totalorder %s1262_s24, %s1258_s23  ;;  %p138_p9 = scmp.eq.s32.totalorder %s937_s27, 3 }
  0x1b   : > { %s1353_s6 = scalar_select %p119_p6, %s1266_s0, %s121_s29  }
  0x1c   : > { %p1355_p10 = por %p132_p7, %p131_p5  ;;  %p1359_p11 = por %p138_p9, %p137_p8 }
  0x1d   : > { %1733 = sst [smem:[#allocation16_spill]] %s1353_s6  ;;  %p938_p12 = scmp.ge.s32.totalorder %s1270_s25, 1 }
  0x1e   : > { %s1734_s7 = scalar_select %p1355_p10, 1, 0 }
  0x1f   : > { %s1736_s8 = scalar_select %p1359_p11, 1, 0 }
  0x20   : > { %1735 = sst [smem:[#allocation17_spill]] %s1734_s7  ;;  %p145_p13 = scmp.lt.s32.totalorder %s1270_s25, 5 }
  0x21   : > { %1737 = sst [smem:[#allocation18_spill]] %s1736_s8  ;;  %p1712_p0 = scmp.eq.s32.totalorder %s1338_s26, 0 }
  0x22   : > { %p1366_p1 = pnand %p938_p12, %p145_p13  ;;  %s1277_s10 = smov [#allocation5]  }
  0x23   : > { %s157_s11 = sshll.u32 %s1277_s10, 4  ;;  %s1740_s1 = sld [smem:[#allocation19_spill]]  ;;  %s158_s11 = int_to_ptr.vmem [resolvable:$true] %s157_s11 }
  0x24   : > { %s1738_s9 = scalar_select %p1366_p1, 1, 0 }
  0x25   : > { %p1098_p2 = pneg %p1366_p1 }
  0x27   : > { %p1374_p3 = pnand %p1712_p0, %p1098_p2 }
  0x29   : > { %s1170_s15 = scalar_lea.hbm %s1740_s1, 16512  ;;  %p1172_p5 = pneg %p1374_p3 }
  0x2a   : > { %p1171_p4 = scmp.ne.s32.totalorder %s1740_s1, %s1170_s15  ;;  %p1177_p8 = scmp.lt.u32.totalorder %s1170_s15, %s1740_s1 }
  0x2c   : > { %p1173_p6 = pnand %p1172_p5, %p1171_p4 }
  0x2e   : > { %p1174_p7 = pneg %p1173_p6 }
  0x30   : > { %p1179_p9 = pnand %p1177_p8, %p1174_p7 }
  0x32   : > { %1182 = shalt.err (!%p1179_p9)
}
  0x33   : > { %s1183_s20 = scalar_lea.vmem %s158_s11, 16512  ;;  %p1191_p0 = scmp.lt.s32.totalorder %s158_s11, %s158_s11 }
  0x34   : > { %p1184_p12 = scmp.ne.s32.totalorder %s158_s11, %s1183_s20  ;;  %p1192_p11 = scmp.lt.s32.totalorder %s1183_s20, %s1183_s20 }
  0x36   : > { %p1186_p13 = pnand %p1184_p12, %p1172_p5  ;;  %p1193_p10 = por %p1192_p11, %p1191_p0 }
  0x38   : > { %p1187_p2 = pneg %p1186_p13 }
  0x3a   : > { %p1194_p1 = pnand %p1193_p10, %p1187_p2 }
  0x3c   : > { %1197 = shalt.err (!%p1194_p1)
}
  0x3d   : > { %s1278_s21 = smov 128   ;;  %s1279_s22 = smov 8  }
  0x3e   : > { %1101 = dma.hbm_to_vmem [thread:$0]  (!%p1374_p3), %s1740_s1, 16512, %s158_s11, [#allocation6], %s1278_s21, %s1278_s21, %s1279_s22  }
  0x3f   : > { %p1741_p4 = scmp.ne.s32.totalorder %s1738_s9, 0 }
  0x40   : > { %p1742_p6 = scmp.eq.s32.totalorder (!%p1741_p4), %s1338_s26, 0 }
  0x41   : > { %188 = sbr.rel (%p1741_p4) target bundleno = 526 (0x20e), region = 36 }
  0x48   : > { %1249 = dma.done.wait (%p1742_p6), [#allocation6], 16512   ;;  %p1743_p5 = pmov %p1742_p6 }
  0x49   : > { %s1715_s30 = sand.u32 1, %s1262_s24   ;;  %s944_s10 = sshll.u32 %s1338_s26, 4 }
  0x4a   : > { %1251 = vsyncadd (%p1743_p5), [#allocation6], 4294950784  ;;  %s943_s12 = sshll.u32 %s1715_s30, 7  ;;  %p215_p10 = scmp.lt.s32.totalorder %s944_s10, 63 }
  0x4b   : > { %s1744_s2 = sld [smem:[#allocation20_spill]]  ;;  %s1409_s15 = scalar_lea.vmem [#allocation8], %s943_s12 }
  0x4c   : > { %s1762_s10 = smov (!%p215_p10, %s944_s10), 63  ;;  %s1411_s16 = smov 0  }
  0x4d   : > { %s945_s13 = sshll.u32 %s1762_s10, 3 }
  0x51   : > { %s1407_s9 = scalar_lea.vmem %s1744_s2, %s945_s13 }
  0x52 LB: >> { %s946_s17 = sshll.u32 %s1338_s26, 7  ;;  %s1716_s18 = sshll.u32 %s1274_s16, 3  ;;  %vm283_vm0 = vcmask 1040384   ;;  %vm285_vm1 = vcmask 1041408   ;;  %vm287_vm2 = vcmask 1042432   ;;  %vm289_vm3 = vcmask 1043456   ;;  %s1274_s16 = sphi %s1411_s16, %s226_s16  }
  0x53   : >> { %s229_s19 = sadd.s32 %s1716_s18, %s946_s17  ;;  %vm291_vm4 = vcmask 1044480   ;;  %vm293_vm5 = vcmask 1045504   ;;  %vm295_vm6 = vcmask 1046528  }
  0x54   : >> { %s1420_s20 = sshll.u32 %s229_s19, 2 }
  0x55   : >> { %s1423_s21 = sld [smem:[#allocation4 + %s1420_s20]]  ;;  %s234_s22 = sadd.s32 4, %s1420_s20 }
  0x56   : >> { %s1426_s27 = sld [smem:[#allocation4 + %s234_s22]]  ;;  %s238_s29 = sadd.s32 8, %s1420_s20 }
  0x57   : >> { %s1429_s10 = sld [smem:[#allocation4 + %s238_s29]]  ;;  %s242_s12 = sadd.s32 12, %s1420_s20 }
  0x58   : >> { %s1432_s13 = sld [smem:[#allocation4 + %s242_s12]]  ;;  %s246_s11 = sadd.s32 16, %s1420_s20 }
  0x59   : >> { %s1435_s14 = sld [smem:[#allocation4 + %s246_s11]]  ;;  %s250_s17 = sadd.s32 20, %s1420_s20 }
  0x5a   : >> { %s1438_s19 = sld [smem:[#allocation4 + %s250_s17]]  ;;  %s254_s30 = sadd.s32 24, %s1420_s20 }
  0x5b   : >> { %s1441_s22 = sld [smem:[#allocation4 + %s254_s30]]  ;;  %s258_s18 = sadd.s32 28, %s1420_s20 }
  0x5c   : >> { %s1444_s29 = sld [smem:[#allocation4 + %s258_s18]]  ;;  %s297_s1 = sadd.s32 1, %s1420_s20 }
  0x5d   : >> { %s1447_s12 = sld [smem:[#allocation4 + %s297_s1]]  ;;  %s301_s2 = sadd.s32 5, %s1420_s20 }
  0x5e   : >> { %s302_s6 = sld [smem:[#allocation4 + %s301_s2]]  ;;  %s305_s11 = sadd.s32 9, %s1420_s20 }
  0x5f   : >> { %s309_s0 = sadd.s32 13, %s1420_s20  ;;  %s306_s17 = sld [smem:[#allocation4 + %s305_s11]] }
  0x60   : >> { %s1452_s28 = sld [smem:[#allocation4 + %s309_s0]]  ;;  %s313_s8 = sadd.s32 17, %s1420_s20 }
  0x61   : >> { %s1455_s30 = sld [smem:[#allocation4 + %s313_s8]]  ;;  %s317_s23 = sadd.s32 21, %s1420_s20 }
  0x62   : >> { %s321_s25 = sadd.s32 25, %s1420_s20  ;;  %s1459_s18 = sld [smem:[#allocation4 + %s317_s23]] }
  0x63   : >> { %s1461_s5 = sld [smem:[#allocation4 + %s321_s25]]  ;;  %s325_s1 = sadd.s32 29, %s1420_s20 }
  0x64   : >> { %s236_s2 = scalar_lea.vmem [#allocation5], %s1426_s27  ;;  %s303_s7 = scalar_lea.vmem [#allocation5], %s302_s6 }
  0x65   : >> { %v237_v0 = vld [vmem:[%s236_s2] sm:$0x1]  ;;  %s1465_s0 = sld [smem:[#allocation4 + %s325_s1]]  ;;  %s358_s11 = sadd.s32 2, %s1420_s20 }
  0x66   : >> { %v304_v1 = vld [vmem:[%s303_s7] sm:$0x1]  ;;  %s240_s8 = scalar_lea.vmem [#allocation5], %s1429_s10  ;;  %s1469_s23 = sld [smem:[#allocation4 + %s358_s11]]  ;;  %v263_v3 = vrot.slane %v237_v0, 7 }
  0x67   : >> { %v241_v2 = vld [vmem:[%s240_s8] sm:$0x1]  ;;  %s307_s25 = scalar_lea.vmem [#allocation5], %s306_s17  ;;  %v330_v5 = vrot.slane %v304_v1, 7  ;;  %s362_s27 = sadd.s32 6, %s1420_s20 }
  0x68   : >> { %v308_v4 = vld [vmem:[%s307_s25] sm:$0x1]  ;;  %s366_s6 = sadd.s32 10, %s1420_s20  ;;  %s232_s2 = scalar_lea.vmem [#allocation5], %s1423_s21  ;;  %v266_v9 = vrot.slane %v241_v2, 6 }
  0x69   : >> { %v233_v6 = vld [vmem:[%s232_s2] sm:$0x1]  ;;  %s299_s7 = scalar_lea.vmem [#allocation5], %s1447_s12  ;;  %s1475_s1 = sld [smem:[#allocation4 + %s362_s27]]  ;;  %v333_v11 = vrot.slane %v308_v4, 6 }
  0x6a   : >> { %v300_v7 = vld [vmem:[%s299_s7] sm:$0x1]  ;;  %s244_s10 = scalar_lea.vmem [#allocation5], %s1432_s13  ;;  %s1478_s11 = sld [smem:[#allocation4 + %s366_s6]]  ;;  %v284_v13 = vsel %vm283_vm0, %v233_v6, %v263_v3 }
  0x6b   : >> { %v245_v8 = vld [vmem:[%s244_s10] sm:$0x1]  ;;  %s311_s17 = scalar_lea.vmem [#allocation5], %s1452_s28  ;;  %s370_s8 = sadd.s32 14, %s1420_s20  ;;  %v350_v14 = vsel %vm283_vm0, %v300_v7, %v330_v5  ;;  %v286_v20 = vsel %vm285_vm1, %v284_v13, %v266_v9 }
  0x6c   : >> { %v312_v10 = vld [vmem:[%s311_s17] sm:$0x1]  ;;  %s248_s25 = scalar_lea.vmem [#allocation5], %s1435_s14  ;;  %s1485_s21 = sld [smem:[#allocation4 + %s370_s8]]  ;;  %v269_v16 = vrot.slane %v245_v8, 5  ;;  %v351_v22 = vsel %vm285_vm1, %v350_v14, %v333_v11 }
  0x6d   : >> { %v249_v12 = vld [vmem:[%s248_s25] sm:$0x1]  ;;  %s374_s13 = sadd.s32 18, %s1420_s20  ;;  %s252_s12 = scalar_lea.vmem [#allocation5], %s1438_s19  ;;  %v336_v18 = vrot.slane %v312_v10, 5 }
  0x6e   : >> { %v1489_v15 = vld [vmem:[%s252_s12] sm:$0x1]  ;;  %s1491_s28 = sld [smem:[#allocation4 + %s374_s13]]  ;;  %s315_s14 = scalar_lea.vmem [#allocation5], %s1455_s30  ;;  %v272_v19 = vrot.slane %v249_v12, 4  ;;  %v288_v30 = vsel %vm287_vm2, %v286_v20, %v269_v16 }
  0x6f   : >> { %v316_v17 = vld [vmem:[%s315_s14] sm:$0x1]  ;;  %s378_s27 = sadd.s32 22, %s1420_s20  ;;  %s382_s6 = sadd.s32 26, %s1420_s20  ;;  %v275_v29 = vrot.slane %v1489_v15, 3  ;;  %v352_v31 = vsel %vm287_vm2, %v351_v22, %v336_v18 }
  0x70   : >> { %s319_s19 = scalar_lea.vmem [#allocation5], %s1459_s18  ;;  %s1499_s2 = sld [smem:[#allocation4 + %s378_s27]]  ;;  %v339_v25 = vrot.slane %v316_v17, 4  ;;  %v290_v40 = vsel %vm289_vm3, %v288_v30, %v272_v19 }
  0x71   : >> { %v320_v21 = vld [vmem:[%s319_s19] sm:$0x1]  ;;  %s360_s7 = scalar_lea.vmem [#allocation5], %s1469_s23  ;;  %s364_s30 = scalar_lea.vmem [#allocation5], %s1475_s1  ;;  %v292_v49 = vsel %vm291_vm4, %v290_v40, %v275_v29 }
  0x72   : >> { %v361_v23 = vld [vmem:[%s360_s7] sm:$0x1]  ;;  %s1503_s10 = sld [smem:[#allocation4 + %s382_s6]]  ;;  %s368_s17 = scalar_lea.vmem [#allocation5], %s1478_s11  ;;  %v342_v36 = vrot.slane %v320_v21, 3  ;;  %v353_v41 = vsel %vm289_vm3, %v352_v31, %v339_v25 }
  0x73   : >> { %v365_v24 = vld [vmem:[%s364_s30] sm:$0x1]  ;;  %s386_s8 = sadd.s32 30, %s1420_s20  ;;  %s419_s18 = sadd.s32 3, %s1420_s20 }
  0x74   : >> { %v369_v26 = vld [vmem:[%s368_s17] sm:$0x1]  ;;  %v391_v27 = vrot.slane %v365_v24, 7  ;;  %s256_s25 = scalar_lea.vmem [#allocation5], %s1441_s22  ;;  %s1512_s23 = sld [smem:[#allocation4 + %s386_s8]]  ;;  %v354_v50 = vsel %vm291_vm4, %v353_v41, %v342_v36 }
  0x75   : >> { %v257_v28 = vld [vmem:[%s256_s25] sm:$0x1]  ;;  %v394_v32 = vrot.slane %v369_v26, 6  ;;  %s323_s1 = scalar_lea.vmem [#allocation5], %s1461_s5  ;;  %s372_s11 = scalar_lea.vmem [#allocation5], %s1485_s21 }
  0x76   : >> { %v324_v33 = vld [vmem:[%s323_s1] sm:$0x1]  ;;  %v411_v35 = vsel %vm283_vm0, %v361_v23, %v391_v27  ;;  %s1517_s22 = sld [smem:[#allocation4 + %s419_s18]]  ;;  %s376_s13 = scalar_lea.vmem [#allocation5], %s1491_s28  ;;  %v278_v46 = vrot.slane %v257_v28, 2 }
  0x77   : >> { %v373_v34 = vld [vmem:[%s372_s11] sm:$0x1]  ;;  %v412_v39 = vsel %vm285_vm1, %v411_v35, %v394_v32  ;;  %s423_s12 = sadd.s32 7, %s1420_s20  ;;  %s427_s14 = sadd.s32 11, %s1420_s20  ;;  %v345_v48 = vrot.slane %v324_v33, 2 }
  0x78   : >> { %v377_v37 = vld [vmem:[%s376_s13] sm:$0x1]  ;;  %v397_v38 = vrot.slane %v373_v34, 5  ;;  %s1525_s5 = sld [smem:[#allocation4 + %s423_s12]]  ;;  %s260_s21 = scalar_lea.vmem [#allocation5], %s1444_s29  ;;  %v294_v56 = vsel %vm293_vm5, %v292_v49, %v278_v46 }
  0x79   : >> { %v400_v42 = vrot.slane %v377_v37, 4  ;;  %v261_v43 = vld [vmem:[%s260_s21] sm:$0x1]  ;;  %s380_s28 = scalar_lea.vmem [#allocation5], %s1499_s2  ;;  %s1530_s27 = sld [smem:[#allocation4 + %s427_s14]]  ;;  %v355_v57 = vsel %vm293_vm5, %v354_v50, %v345_v48 }
  0x7a   : >> { %v381_v44 = vld [vmem:[%s380_s28] sm:$0x1]  ;;  %v413_v45 = vsel %vm287_vm2, %v412_v39, %v397_v38  ;;  %s327_s6 = scalar_lea.vmem [#allocation5], %s1465_s0  ;;  %s431_s19 = sadd.s32 15, %s1420_s20  ;;  %v281_v54 = vrot.slane %v261_v43, 1 }
  0x7b   : >> { %v328_v47 = vld [vmem:[%s327_s6] sm:$0x1]  ;;  %s435_s7 = sadd.s32 19, %s1420_s20  ;;  %s384_s29 = scalar_lea.vmem [#allocation5], %s1503_s10  ;;  %v403_v52 = vrot.slane %v381_v44, 3  ;;  %v414_v53 = vsel %vm289_vm3, %v413_v45, %v400_v42 }
  0x7c   : >> { %v385_v51 = vld [vmem:[%s384_s29] sm:$0x1]  ;;  %s1538_s2 = sld [smem:[#allocation4 + %s431_s19]]  ;;  %v348_v55 = vrot.slane %v328_v47, 1  ;;  %s439_s30 = sadd.s32 23, %s1420_s20  ;;  %v296_v1 = vsel %vm295_vm6, %v294_v56, %v281_v54 }
  0x7d   : >> { %s1541_s0 = sld [smem:[#allocation4 + %s435_s7]]  ;;  %s443_s17 = sadd.s32 27, %s1420_s20  ;;  %v406_v59 = vrot.slane %v385_v51, 2  ;;  %v415_v60 = vsel %vm291_vm4, %v414_v53, %v403_v52 }
  0x7e   : >> { %s388_s10 = scalar_lea.vmem [#allocation5], %s1512_s23  ;;  %s440_s8 = sld [smem:[#allocation4 + %s439_s30]]  ;;  %v356_v2 = vsel %vm295_vm6, %v355_v57, %v348_v55 }
  0x7f   : >> { %v389_v58 = vld [vmem:[%s388_s10] sm:$0x1]  ;;  %s421_s18 = scalar_lea.vmem [#allocation5], %s1517_s22  ;;  %s425_s25 = scalar_lea.vmem [#allocation5], %s1525_s5  ;;  %v416_v5 = vsel %vm293_vm5, %v415_v60, %v406_v59  ;;  %v357_v11 = vadd.f32 %v356_v2, %v296_v1 }
  0x80   : >> { %v422_v61 = vld [vmem:[%s421_s18] sm:$0x1]  ;;  %s444_s1 = sld [smem:[#allocation4 + %s443_s17]]  ;;  %s429_s11 = scalar_lea.vmem [#allocation5], %s1530_s27  ;;  %v409_v3 = vrot.slane %v389_v58, 1 }
  0x81   : >> { %v426_v62 = vld [vmem:[%s425_s25] sm:$0x1]  ;;  %s447_s13 = sadd.s32 31, %s1420_s20  ;;  %s1745_s21 = sshll.u32 %s1274_s16, 3 }
  0x82   : >> { %v430_v63 = vld [vmem:[%s429_s11] sm:$0x1]  ;;  %v452_v0 = vrot.slane %v426_v62, 7  ;;  %s448_s23 = sld [smem:[#allocation4 + %s447_s13]]  ;;  %s433_s12 = scalar_lea.vmem [#allocation5], %s1538_s2  ;;  %v417_v13 = vsel %vm295_vm6, %v416_v5, %v409_v3 }
  0x83   : >> { %v455_v4 = vrot.slane %v430_v63, 6  ;;  %v434_v6 = vld [vmem:[%s433_s12] sm:$0x1]  ;;  %s437_s22 = scalar_lea.vmem [#allocation5], %s1541_s0  ;;  %v418_v20 = vadd.f32 %v417_v13, %v357_v11  ;;  %s480_s28 = scalar_lea.vmem [#allocation2], %s1745_s21 }
  0x84   : >> { %v472_v7 = vsel %vm283_vm0, %v422_v61, %v452_v0  ;;  %v438_v8 = vld [vmem:[%s437_s22] sm:$0x1]  ;;  %v458_v9 = vrot.slane %v434_v6, 5  ;;  %s441_s20 = scalar_lea.vmem [#allocation5], %s440_s8  ;;  %s226_s16 = sadd.s32 1, %s1274_s16  }
  0x85   : >> { %v473_v10 = vsel %vm285_vm1, %v472_v7, %v455_v4  ;;  %v461_v12 = vrot.slane %v438_v8, 4  ;;  %v442_v14 = vld [vmem:[%s441_s20] sm:$0x1]  ;;  %p223_p11 = scmp.ge.s32.totalorder %s226_s16, 16  }
  0x86   : >> { %v474_v15 = vsel %vm287_vm2, %v473_v10, %v458_v9  ;;  %s445_s14 = scalar_lea.vmem [#allocation5], %s444_s1  ;;  %v464_v17 = vrot.slane %v442_v14, 3  ;;  %v499_v27 = vld [vmem:[%s1407_s9 + $0x8] sm:$0xff] (%p223_p11)  ;;  %v498_v28 = vld [vmem:[%s1407_s9] sm:$0xff] (%p223_p11)  ;;  %v1280_v29 = vmov (%p223_p11), 0   ;;  %v612_v35 = vld [vmem:[%s1709_s3 + $0x10] sm:$0xff] (%p223_p11) }
  0x87   : >> { %v446_v16 = vld [vmem:[%s445_s14] sm:$0x1]  ;;  %v475_v18 = vsel %vm289_vm3, %v474_v15, %v461_v12  ;;  %1157 = vset.pattern.permute.xlu1 (%p223_p11), %v1280_v29  ;;  %1156 = vset.pattern.permute.xlu0 (%p223_p11), %v1280_v29  ;;  %v507_v30 = vld [vmem:[%s1407_s9 + $0x48] sm:$0xff] (%p223_p11)  ;;  %v613_v36 = vld [vmem:[%s1709_s3 + $0x18] sm:$0xff] (%p223_p11)  ;;  %s955_s30 = sshll.u32 (%p223_p11), %s1338_s26, 11  ;;  %s824_s17 = sshll.u32 (%p223_p11), %s1409_s15, 4  ;;  %s1657_s17 = int_to_ptr.vmem [resolvable:$true] %s824_s17 }
  0x88   : >> { %v467_v19 = vrot.slane %v446_v16, 2  ;;  %s449_s5 = scalar_lea.vmem [#allocation5], %s448_s23  ;;  %v476_v22 = vsel %vm291_vm4, %v475_v18, %v464_v17  ;;  %521 = vperm.xlu1 (%p223_p11), %1157, %v499_v27   ;;  %516 = vperm.xlu0 (%p223_p11), %1156, %v498_v28   ;;  %v506_v31 = vld [vmem:[%s1407_s9 + $0x40] sm:$0xff] (%p223_p11)  ;;  %v611_v33 = vld [vmem:[%s1709_s3 + $0x8] sm:$0xff] (%p223_p11)  ;;  %v508_v37 = vld [vmem:[%s1407_s9 + $0x50] sm:$0xff] (%p223_p11)  ;;  %v1048_v39 = vpack.c.bf16 (%p223_p11), %v613_v36, %v612_v35  ;;  %s1746_s10 = sld [smem:[#allocation17_spill]] (%p223_p11) }
  0x89   : >> { %v450_v21 = vld [vmem:[%s449_s5] sm:$0x1]  ;;  %225 = sbr.rel (!%p223_p11) target bundleno = 82 (0x52), region = 116  ;;  %v500_v38 = vld [vmem:[%s1407_s9 + $0x10] sm:$0xff] (%p223_p11)  ;;  %v615_v41 = vld [vmem:[%s1709_s3 + $0x28] sm:$0xff] (%p223_p11)  ;;  %s1747_s25 = sld [smem:[#allocation21_spill]] (%p223_p11) }
  0x8a   : >> { %v470_v23 = vrot.slane %v450_v21, 1  ;;  %v477_v24 = vsel %vm293_vm5, %v476_v22, %v467_v19  ;;  %v610_v32 = vld [vmem:[%s1709_s3] sm:$0xff] (%p223_p11)  ;;  %v509_v42 = vld [vmem:[%s1407_s9 + $0x58] sm:$0xff] (%p223_p11)  ;;  %v616_v45 = vld [vmem:[%s1709_s3 + $0x30] sm:$0xff] (%p223_p11)  ;;  %s1749_s26 = sand.u32 (%p223_p11), 1, %s1262_s24   ;;  %s1198_s23 = scalar_lea.vmem (%p223_p11), %s1657_s17, 2048 }
  0x8b   : > { %v1044_v34 = vpack.c.bf16 (%p223_p11), %v611_v33, %v610_v32  ;;  %v614_v40 = vld [vmem:[%s1709_s3 + $0x20] sm:$0xff] (%p223_p11)  ;;  %v501_v43 = vld [vmem:[%s1407_s9 + $0x18] sm:$0xff] (%p223_p11)  ;;  %v619_v51 = vld [vmem:[%s1709_s3 + $0x48] sm:$0xff] (%p223_p11)  ;;  %s1665_s13 = scalar_lea.sflag (%p223_p11), [#allocation7], %s1749_s26  ;;  %p1199_p0 = scmp.ne.s32.totalorder (%p223_p11), %s1657_s17, %s1198_s23 }
  0x8c   : >> { %v478_v25 = vsel %vm295_vm6, %v477_v24, %v470_v23  ;;  %561 = vperm.xlu1 (%p223_p11), %1157, %v507_v30   ;;  %556 = vperm.xlu0 (%p223_p11), %1156, %v506_v31   ;;  %v1052_v44 = vpack.c.bf16 (%p223_p11), %v615_v41, %v614_v40  ;;  %v617_v46 = vld [vmem:[%s1709_s3 + $0x38] sm:$0xff] (%p223_p11)  ;;  %v510_v47 = vld [vmem:[%s1407_s9 + $0x60] sm:$0xff] (%p223_p11)  ;;  %v511_v52 = vld [vmem:[%s1407_s9 + $0x68] sm:$0xff] (%p223_p11)  ;;  %s1281_s12 = smov (%p223_p11), [#allocation8]  }
  0x8d   : >> { %v479_v26 = vadd.f32 %v478_v25, %v418_v20  ;;  %1045 = vmatprep.subr.bf16.mxu0 (%p223_p11), %v1044_v34  ;;  %1076 = vmatprep.subr.bf16.mxu1 (%p223_p11), %v1044_v34  ;;  %v502_v48 = vld [vmem:[%s1407_s9 + $0x20] sm:$0xff] (%p223_p11)  ;;  %v1056_v49 = vpack.c.bf16 (%p223_p11), %v617_v46, %v616_v45  ;;  %v503_v53 = vld [vmem:[%s1407_s9 + $0x28] sm:$0xff] (%p223_p11)  ;;  %v620_v55 = vld [vmem:[%s1709_s3 + $0x50] sm:$0xff] (%p223_p11)  ;;  %s1202_s22 = sshll.u32 (%p223_p11), %s1281_s12, 4  ;;  %s1203_s22 = int_to_ptr.vmem [resolvable:$false] %s1202_s22 }
  0x8e   : > { %1047 = vmatpush3.bf16.msra.mxu0 (%p223_p11), %v1044_v34  ;;  %1084 = vmatpush3.bf16.msra.mxu1 (%p223_p11), %v1044_v34  ;;  %v618_v50 = vld [vmem:[%s1709_s3 + $0x40] sm:$0xff] (%p223_p11)  ;;  %v621_v56 = vld [vmem:[%s1709_s3 + $0x58] sm:$0xff] (%p223_p11)  ;;  %v512_v57 = vld [vmem:[%s1407_s9 + $0x70] sm:$0xff] (%p223_p11)  ;;  %p1750_p1 = scmp.ne.s32.totalorder (%p223_p11), %s1746_s10, 0  ;;  %s1204_s20 = scalar_lea.vmem (%p223_p11), %s1203_s22, 4096 }
  0x8f   : >> { %481 = vst [vmem:[%s480_s28] sm:$0xff] %v479_v26  ;;  %1049 = vmatprep.subr.bf16.mxu0 (%p223_p11), %v1048_v39  ;;  %1077 = vmatprep.subr.bf16.mxu1 (%p223_p11), %v1048_v39  ;;  %v1060_v54 = vpack.c.bf16 (%p223_p11), %v619_v51, %v618_v50  ;;  %v504_v58 = vld [vmem:[%s1407_s9 + $0x30] sm:$0xff] (%p223_p11)  ;;  %v1064_v59 = vpack.c.bf16 (%p223_p11), %v621_v56, %v620_v55  ;;  %v622_v60 = vld [vmem:[%s1709_s3 + $0x60] sm:$0xff] (%p223_p11)  ;;  %v623_v61 = vld [vmem:[%s1709_s3 + $0x68] sm:$0xff] (%p223_p11)  ;;  %s1748_s1 = smov (%p223_p11), %s1747_s25  ;;  %s1655_s11 = scalar_lea.hbm (%p223_p11), %s1747_s25, %s955_s30 }
  0x90   : > { %566 = vperm.xlu1 %1157, %v508_v37   ;;  %526 = vperm.xlu0 %1156, %v500_v38   ;;  %v513_v62 = vld [vmem:[%s1407_s9 + $0x78] sm:$0xff]  ;;  %v1068_v0 = vpack.c.bf16 %v623_v61, %v622_v60  ;;  %v624_v1 = vld [vmem:[%s1709_s3 + $0x70] sm:$0xff]  ;;  %p1200_p3 = pnand %p1199_p0, %p1750_p1  ;;  %p1205_p8 = scmp.lt.s32.totalorder %s1657_s17, %s1203_s22 }
  0x91   : > { %v505_v63 = vld [vmem:[%s1407_s9 + $0x38] sm:$0xff]  ;;  %p1206_p9 = scmp.lt.s32.totalorder %s1204_s20, %s1198_s23 }
  0x92   : > { %1051 = vmatpush3.bf16.msra.mxu0 %v1048_v39  ;;  %1085 = vmatpush3.bf16.msra.mxu1 %v1048_v39  ;;  %v625_v2 = vld [vmem:[%s1709_s3 + $0x78] sm:$0xff]  ;;  %p1201_p7 = pneg %p1200_p3 }
  0x93   : > { %1053 = vmatprep.subr.bf16.mxu0 %v1052_v44  ;;  %1078 = vmatprep.subr.bf16.mxu1 %v1052_v44  ;;  %v1072_v3 = vpack.c.bf16 %v625_v2, %v624_v1  ;;  %p1207_p12 = por %p1206_p9, %p1205_p8 }
  0x94   : > { %571 = vperm.xlu1 %1157, %v509_v42   ;;  %531 = vperm.xlu0 %1156, %v501_v43  }
  0x95   : > { %p1208_p13 = pnand %p1207_p12, %p1201_p7 }
  0x96   : > { %1055 = vmatpush3.bf16.msra.mxu0 %v1052_v44  ;;  %1086 = vmatpush3.bf16.msra.mxu1 %v1052_v44  ;;  %v483_v4 = vld [vmem:[#allocation2 + $0x8] sm:$0xff]  ;;  %v482_v5 = vld [vmem:[#allocation2] sm:$0xff]  ;;  %v492_v16 = vld [vmem:[#allocation2 + $0x50] sm:$0xff] }
  0x97   : > { %1057 = vmatprep.subr.bf16.mxu0 %v1056_v49  ;;  %1079 = vmatprep.subr.bf16.mxu1 %v1056_v49  ;;  %v491_v10 = vld [vmem:[#allocation2 + $0x48] sm:$0xff]  ;;  %v490_v11 = vld [vmem:[#allocation2 + $0x40] sm:$0xff]  ;;  %v484_v17 = vld [vmem:[#allocation2 + $0x10] sm:$0xff] }
  0x98   : > { %576 = vperm.xlu1 %1157, %v510_v47   ;;  %536 = vperm.xlu0 %1156, %v502_v48   ;;  %v493_v22 = vld [vmem:[#allocation2 + $0x58] sm:$0xff]  ;;  %v494_v28 = vld [vmem:[#allocation2 + $0x60] sm:$0xff]  ;;  %v495_v34 = vld [vmem:[#allocation2 + $0x68] sm:$0xff] }
  0x99   : > { %v485_v23 = vld [vmem:[#allocation2 + $0x18] sm:$0xff]  ;;  %v486_v29 = vld [vmem:[#allocation2 + $0x20] sm:$0xff]  ;;  %v487_v35 = vld [vmem:[#allocation2 + $0x28] sm:$0xff] }
  0x9a   : > { %1059 = vmatpush3.bf16.msra.mxu0 %v1056_v49  ;;  %1087 = vmatpush3.bf16.msra.mxu1 %v1056_v49  ;;  %v496_v40 = vld [vmem:[#allocation2 + $0x70] sm:$0xff]  ;;  %v497_v46 = vld [vmem:[#allocation2 + $0x78] sm:$0xff] }
  0x9b   : > { %1061 = vmatprep.subr.bf16.mxu0 %v1060_v54  ;;  %1080 = vmatprep.subr.bf16.mxu1 %v1060_v54  ;;  %v488_v41 = vld [vmem:[#allocation2 + $0x30] sm:$0xff]  ;;  %v489_v47 = vld [vmem:[#allocation2 + $0x38] sm:$0xff] }
  0x9c   : > { %581 = vperm.xlu1 %1157, %v511_v52   ;;  %541 = vperm.xlu0 %1156, %v503_v53   ;;  %v949_v52 = vld [vmem:[%s1710_s4] ss:$0 sm:$0xff] }
  0x9e   : > { %1063 = vmatpush3.bf16.msra.mxu0 %v1060_v54  ;;  %1088 = vmatpush3.bf16.msra.mxu1 %v1060_v54 }
  0x9f   : > { %1065 = vmatprep.subr.bf16.mxu0 %v1064_v59  ;;  %1081 = vmatprep.subr.bf16.mxu1 %v1064_v59 }
  0xa0   : > { %586 = vperm.xlu1 %1157, %v512_v57   ;;  %546 = vperm.xlu0 %1156, %v504_v58  }
  0xa2   : > { %1067 = vmatpush3.bf16.msra.mxu0 %v1064_v59  ;;  %1089 = vmatpush3.bf16.msra.mxu1 %v1064_v59 }
  0xa3   : > { %1069 = vmatprep.subr.bf16.mxu0 %v1068_v0  ;;  %1082 = vmatprep.subr.bf16.mxu1 %v1068_v0 }
  0xa4   : > { %591 = vperm.xlu1 %1157, %v513_v62   ;;  %551 = vperm.xlu0 %1156, %v505_v63  }
  0xa6   : > { %1071 = vmatpush3.bf16.msra.mxu0 %v1068_v0  ;;  %1090 = vmatpush3.bf16.msra.mxu1 %v1068_v0 }
  0xa7   : > { %1073 = vmatprep.subr.bf16.mxu0 %v1072_v3  ;;  %1083 = vmatprep.subr.bf16.mxu1 %v1072_v3 }
  0xaa   : > { %1075 = vmatpush3.bf16.msra.mxu0 %v1072_v3  ;;  %1091 = vmatpush3.bf16.msra.mxu1 %v1072_v3 }
 0x107   : > { %v522_v6 = vpop.permute.xlu1 %521  ;;  %v517_v7 = vpop.permute.xlu0 %516 }
 0x108   : > { %v595_v8 = vmul.f32 %v522_v6, %v483_v4  ;;  %v594_v9 = vmul.f32 %v517_v7, %v482_v5 }
 0x10a   : > { %1020 = vmatprep.mubr.f32.mxu0 %v594_v9 }
 0x10b   : > { %v562_v12 = vpop.permute.xlu1 %561  ;;  %v557_v13 = vpop.permute.xlu0 %556  ;;  %1021 = vmatmul.mubr.f32.vlgmr.msra.gmra.mrb[0].mxu0 %v595_v8 }
 0x10c   : > { %v603_v14 = vmul.f32 %v562_v12, %v491_v10  ;;  %v602_v15 = vmul.f32 %v557_v13, %v490_v11 }
 0x10e   : > { %1032 = vmatprep.mubr.f32.mxu1 %v602_v15 }
 0x10f   : > { %v567_v18 = vpop.permute.xlu1 %566  ;;  %v527_v19 = vpop.permute.xlu0 %526  ;;  %1033 = vmatmul.mubr.f32.vlgmr.msra.gmra.mrb[0].mxu1 %v603_v14 }
 0x110   : > { %v604_v20 = vmul.f32 %v567_v18, %v492_v16  ;;  %v596_v21 = vmul.f32 %v527_v19, %v484_v17 }
 0x112   : > { %1023 = vmatprep.mubr.f32.mxu0 %v596_v21  ;;  %1035 = vmatprep.mubr.f32.mxu1 %v604_v20 }
 0x113   : > { %v572_v24 = vpop.permute.xlu1 %571  ;;  %v532_v25 = vpop.permute.xlu0 %531 }
 0x114   : > { %v605_v26 = vmul.f32 %v572_v24, %v493_v22  ;;  %v597_v27 = vmul.f32 %v532_v25, %v485_v23 }
 0x116   : > { %1024 = vmatmul.mubr.f32.gmra.mrb[2].mxu0 %v597_v27  ;;  %1036 = vmatmul.mubr.f32.gmra.mrb[2].mxu1 %v605_v26 }
 0x117   : > { %v577_v30 = vpop.permute.xlu1 %576  ;;  %v537_v31 = vpop.permute.xlu0 %536 }
 0x118   : > { %v606_v32 = vmul.f32 %v577_v30, %v494_v28  ;;  %v598_v33 = vmul.f32 %v537_v31, %v486_v29 }
 0x11a   : > { %1026 = vmatprep.mubr.f32.mxu0 %v598_v33  ;;  %1038 = vmatprep.mubr.f32.mxu1 %v606_v32 }
 0x11b   : > { %v582_v36 = vpop.permute.xlu1 %581  ;;  %v542_v37 = vpop.permute.xlu0 %541 }
 0x11c   : > { %v607_v38 = vmul.f32 %v582_v36, %v495_v34  ;;  %v599_v39 = vmul.f32 %v542_v37, %v487_v35 }
 0x11e   : > { %1027 = vmatmul.mubr.f32.gmra.mrb[4].mxu0 %v599_v39  ;;  %1039 = vmatmul.mubr.f32.gmra.mrb[4].mxu1 %v607_v38 }
 0x11f   : > { %v587_v42 = vpop.permute.xlu1 %586  ;;  %v547_v43 = vpop.permute.xlu0 %546 }
 0x120   : > { %v608_v44 = vmul.f32 %v587_v42, %v496_v40  ;;  %v600_v45 = vmul.f32 %v547_v43, %v488_v41 }
 0x122   : > { %1029 = vmatprep.mubr.f32.mxu0 %v600_v45  ;;  %1041 = vmatprep.mubr.f32.mxu1 %v608_v44 }
 0x123   : > { %v592_v48 = vpop.permute.xlu1 %591  ;;  %v552_v49 = vpop.permute.xlu0 %551 }
 0x124   : > { %v609_v50 = vmul.f32 %v592_v48, %v497_v46  ;;  %v601_v51 = vmul.f32 %v552_v49, %v489_v47 }
 0x126   : > { %1030 = vmatmul.mubr.f32.gmra.mrb[6].mxu0 %v601_v51  ;;  %1042 = vmatmul.mubr.f32.gmra.mrb[6].mxu1 %v609_v50 }
 0x1de   : > { %v1022_v53 = vpop.f32.mrb[0].mxu0 }
 0x1df   : > { %v705_v54 = vadd.f32 %v1022_v53, %v949_v52  ;;  %v699_v55 = vpop.f32.mrb[1].mxu0 }
 0x1e0   : > { %v700_v56 = vadd.f32 %v949_v52, %v699_v55 }
 0x1e1   : > { %v779_v57 = vmax.f32 %v705_v54, 0.0 }
 0x1e2   : > { %v778_v58 = vmax.f32 %v700_v56, 0.0  ;;  %v1034_v59 = vpop.f32.mrb[0].mxu1 }
 0x1e3   : > { %795 = vst [vmem:[%s1409_s15 + $0x8] sm:$0xff] %v779_v57  ;;  %v745_v60 = vadd.f32 %v1034_v59, %v949_v52  ;;  %v739_v61 = vpop.f32.mrb[1].mxu1 }
 0x1e4   : > { %794 = vst [vmem:[%s1409_s15] sm:$0xff] %v778_v58  ;;  %v740_v62 = vadd.f32 %v949_v52, %v739_v61 }
 0x1e5   : > { %v787_v63 = vmax.f32 %v745_v60, 0.0 }
 0x1e6   : > { %v786_v0 = vmax.f32 %v740_v62, 0.0 }
 0x1e7   : > { %803 = vst [vmem:[%s1409_s15 + $0x48] sm:$0xff] %v787_v63 }
 0x1e8   : > { %802 = vst [vmem:[%s1409_s15 + $0x40] sm:$0xff] %v786_v0 }
 0x1e9   : > { %v1025_v1 = vpop.f32.mrb[2].mxu0  ;;  %v1037_v2 = vpop.f32.mrb[2].mxu1 }
 0x1ea   : > { %v715_v3 = vadd.f32 %v1025_v1, %v949_v52  ;;  %v755_v4 = vadd.f32 %v1037_v2, %v949_v52  ;;  %v709_v5 = vpop.f32.mrb[3].mxu0  ;;  %v749_v6 = vpop.f32.mrb[3].mxu1 }
 0x1eb   : > { %v710_v7 = vadd.f32 %v949_v52, %v709_v5  ;;  %v750_v8 = vadd.f32 %v949_v52, %v749_v6 }
 0x1ec   : > { %v781_v9 = vmax.f32 %v715_v3, 0.0  ;;  %v789_v10 = vmax.f32 %v755_v4, 0.0 }
 0x1ed   : > { %v780_v11 = vmax.f32 %v710_v7, 0.0  ;;  %v788_v12 = vmax.f32 %v750_v8, 0.0 }
 0x1ee   : > { %797 = vst [vmem:[%s1409_s15 + $0x18] sm:$0xff] %v781_v9  ;;  %805 = vst [vmem:[%s1409_s15 + $0x58] sm:$0xff] %v789_v10 }
 0x1ef   : > { %796 = vst [vmem:[%s1409_s15 + $0x10] sm:$0xff] %v780_v11  ;;  %804 = vst [vmem:[%s1409_s15 + $0x50] sm:$0xff] %v788_v12 }
 0x1f1   : > { %v1028_v13 = vpop.f32.mrb[4].mxu0  ;;  %v1040_v14 = vpop.f32.mrb[4].mxu1 }
 0x1f2   : > { %v725_v15 = vadd.f32 %v1028_v13, %v949_v52  ;;  %v765_v16 = vadd.f32 %v1040_v14, %v949_v52  ;;  %v719_v17 = vpop.f32.mrb[5].mxu0  ;;  %v759_v18 = vpop.f32.mrb[5].mxu1 }
 0x1f3   : > { %v720_v19 = vadd.f32 %v949_v52, %v719_v17  ;;  %v760_v20 = vadd.f32 %v949_v52, %v759_v18 }
 0x1f4   : > { %v783_v21 = vmax.f32 %v725_v15, 0.0  ;;  %v791_v22 = vmax.f32 %v765_v16, 0.0 }
 0x1f5   : > { %v782_v23 = vmax.f32 %v720_v19, 0.0  ;;  %v790_v24 = vmax.f32 %v760_v20, 0.0 }
 0x1f6   : > { %799 = vst [vmem:[%s1409_s15 + $0x28] sm:$0xff] %v783_v21  ;;  %807 = vst [vmem:[%s1409_s15 + $0x68] sm:$0xff] %v791_v22 }
 0x1f7   : > { %798 = vst [vmem:[%s1409_s15 + $0x20] sm:$0xff] %v782_v23  ;;  %806 = vst [vmem:[%s1409_s15 + $0x60] sm:$0xff] %v790_v24 }
 0x1f9   : > { %v1031_v25 = vpop.f32.mrb[6].mxu0  ;;  %v1043_v26 = vpop.f32.mrb[6].mxu1 }
 0x1fa   : > { %v735_v27 = vadd.f32 %v1031_v25, %v949_v52  ;;  %v775_v28 = vadd.f32 %v1043_v26, %v949_v52  ;;  %v729_v29 = vpop.f32.mrb[7].mxu0  ;;  %v769_v30 = vpop.f32.mrb[7].mxu1 }
 0x1fb   : > { %v730_v31 = vadd.f32 %v949_v52, %v729_v29  ;;  %v770_v32 = vadd.f32 %v949_v52, %v769_v30 }
 0x1fc   : > { %v785_v33 = vmax.f32 %v735_v27, 0.0  ;;  %v793_v34 = vmax.f32 %v775_v28, 0.0 }
 0x1fd   : > { %v784_v35 = vmax.f32 %v730_v31, 0.0  ;;  %v792_v36 = vmax.f32 %v770_v32, 0.0 }
 0x1fe   : > { %801 = vst [vmem:[%s1409_s15 + $0x38] sm:$0xff] %v785_v33  ;;  %809 = vst [vmem:[%s1409_s15 + $0x78] sm:$0xff] %v793_v34 }
 0x1ff   : > { %800 = vst [vmem:[%s1409_s15 + $0x30] sm:$0xff] %v784_v35  ;;  %808 = vst [vmem:[%s1409_s15 + $0x70] sm:$0xff] %v792_v36 }
 0x200   : > { %1211 = shalt.err (!%p1208_p13)
}
 0x201   : > { %s1212_s15 = scalar_lea.hbm %s1655_s11, 2048  ;;  %s1216_s21 = scalar_lea.hbm %s1748_s1, 8192 }
 0x202   : > { %p1213_p2 = scmp.ne.s32.totalorder %s1655_s11, %s1212_s15  ;;  %p1217_p5 = scmp.lt.u32.totalorder %s1655_s11, %s1748_s1 }
 0x203   : > { %p1218_p10 = scmp.lt.u32.totalorder %s1216_s21, %s1212_s15  ;;  %p1220_p0 = scmp.lt.u32.totalorder %s1212_s15, %s1655_s11 }
 0x204   : > { %p1214_p4 = pnand %p1213_p2, %p1750_p1 }
 0x205   : > { %p1219_p11 = por %p1218_p10, %p1217_p5 }
 0x206   : > { %p1215_p6 = pneg %p1214_p4 }
 0x207   : > { %p1221_p3 = por %p1220_p0, %p1219_p11 }
 0x209   : > { %p1222_p7 = pnand %p1221_p3, %p1215_p6 }
 0x20b   : > { %1225 = shalt.err (!%p1222_p7)
}
 0x20c   : > { %s1282_s6 = smov 128   ;;  %s1283_s16 = smov 8  }
 0x20d   : > { %1096 = dma.vmem_to_hbm [thread:$0]  (%p1750_p1), %s1657_s17, 2048, %s1655_s11, %s1665_s13, %s1282_s6, %s1282_s6, %s1283_s16  }
 0x20e PF: > { %s1751_s19 = sld [smem:[#allocation14_spill]]  ;;  %s1752_s7 = sld [smem:[#allocation12_spill]] }
 0x20f   : > { %s1753_s29 = sld [smem:[#allocation18_spill]] }
 0x214   : > { %p1108_p8 = scmp.ge.s32.totalorder %s1751_s19, 2  ;;  %s839_s2 = sand.u32 1, %s1752_s7  }
 0x215   : > { %p1754_p9 = scmp.ne.s32.totalorder %s1753_s29, 0  ;;  %s840_s9 = scalar_lea.sflag [#allocation7], %s839_s2 }
 0x217   : > { %p1103_p12 = pnand %p1108_p8, %p1754_p9 }
 0x219   : > { %1253 = dma.done.wait (!%p1103_p12), %s840_s9, 2048  }
 0x21a   : > { %1255 = vsyncadd (!%p1103_p12), %s840_s9, 4294965248  ;;  %s1755_s25 = sld [smem:[#allocation15_spill]]  ;;  %s1756_s0 = sld [smem:[#allocation13_spill]] }
 0x21b   : > { %s1757_s30 = sld [smem:[#allocation16_spill]]  ;;  %s1758_s23 = smov %s1262_s24 }
 0x220   : > { %p22_p13 = scmp.ge.s32.totalorder %s1755_s25, 6   ;;  %s1759_s24 = smov %s1756_s0 }
 0x221   : > { %s1760_s0 = smov %s1757_s30 }
 0x222   :  { %24 = sbr.rel (!%p22_p13) target bundleno = 20 (0x14), region = 127 }
 0x229   :  { %845 = vsyncpa [#allocation6], 1 }
 0x22a   :  { %847 = vsyncpa [#allocation6 + $0x1], 1 }
 0x22b   :  { %848 = vsyncpa [#allocation7], 1 }
 0x22c   :  { %850 = vsyncpa [#allocation7 + $0x1], 1 }

</bundles_post_ra>
